<compile_context>
chip_gen: v7x
topology: tpu7x:2x2x1
jax: 0.10.0
libtpu: 0.0.40
codegen_flags: <defaults>
</compile_context>

<pallas_src>
import functools

import jax
import jax.numpy as jnp
from jax import lax
from jax.experimental import pallas as pl
from jax.experimental.pallas import tpu as pltpu


def _round_up(x: int, m: int) -> int:
    return ((x + m - 1) // m) * m


def _choose_chunk(row_tile: int, chunk_req: int) -> int:
    """Largest multiple of 128 that divides row_tile and is <= chunk_req."""
    m = row_tile // 128
    limit = max(chunk_req // 128, 1)
    best = 1
    for d in range(1, m + 1):
        if m % d == 0 and d <= limit:
            best = d
    return best * 128


def _make_mlp_kernel(num_rest: int, n_chunks: int, chunk: int, use_bf16: bool):
    """Kernel body.  refs layout (num_rest > 0):
        x_ref   : (row_tile, seq)     natural ndvi_flat block (rows on sublanes)
        w0_ref  : (H, seq)            first Linear weight, transposed
        b0_ref  : (H, 1)
        wr_ref  : (R, H, H)           stacked transposed hidden Linear weights
        br_ref  : (R, H, 1)           stacked hidden biases
        wl_ref  : (H, 1)              final Linear weight (in, out=1)
        bl_ref  : (1, 1)
        o_ref   : (1, row_tile)       lane-dense output block
    """
    cdt = jnp.bfloat16 if use_bf16 else jnp.float32

    def kernel(*refs):
        if num_rest > 0:
            (x_ref, w0_ref, b0_ref, wr_ref, br_ref,
             wl_ref, bl_ref, o_ref) = refs
        else:
            x_ref, w0_ref, b0_ref, wl_ref, bl_ref, o_ref = refs
            wr_ref = br_ref = None

        # Hoisted parameter loads / casts (once per grid step, shared by all chunks).
        w0 = w0_ref[...].astype(cdt)                       # (H, seq)
        b0 = b0_ref[...].astype(jnp.float32)               # (H, 1)
        w_rest = [wr_ref[r].astype(cdt) for r in range(num_rest)]
        b_rest = [br_ref[r].astype(jnp.float32) for r in range(num_rest)]
        w_last = wl_ref[...].astype(jnp.float32)           # (H, 1)
        b_last = bl_ref[...].astype(jnp.float32)           # (1, 1)

        def chunk_body(c, carry):
            start = pl.multiple_of(c * chunk, chunk)
            xc = x_ref[pl.ds(start, chunk), :].astype(cdt)  # (chunk, seq)

            # First layer: h = W0^T @ x^T computed as A @ B^T on the MXU
            # (contraction on the last dim of both operands) -> (H, chunk).
            h = lax.dot_general(w0, xc, (((1,), (1,)), ((), ())),
                                preferred_element_type=jnp.float32)
            h = jnp.maximum(h + b0, 0.0)

            # Remaining hidden layers: (H, H) @ (H, chunk) MXU matmuls.
            for w, b in zip(w_rest, b_rest):
                h = jnp.dot(w, h.astype(cdt),
                            preferred_element_type=jnp.float32)
                h = jnp.maximum(h + b, 0.0)

            # Final Linear(H, 1): VPU multiply + sublane reduce (no N=1 matmul);
            # result is a lane-dense (1, chunk) row.
            out = jnp.sum(h * w_last, axis=0, keepdims=True) + b_last
            o_ref[:, pl.ds(start, chunk)] = out.astype(o_ref.dtype)
            return carry

        lax.fori_loop(0, n_chunks, chunk_body, None, unroll=True)

    return kernel


def init_params(key, sequence_length: int, hidden_size: int, num_layers: int,
                dtype=jnp.float32):
    """PyTorch-Linear-style init: U(-1/sqrt(fan_in), 1/sqrt(fan_in)).

    Returns list of (w, b) with w: (in_features, out_features), b: (out_features,).
    """
    dims = [sequence_length] + [hidden_size] * num_layers + [1]
    params = []
    for i in range(len(dims) - 1):
        fan_in, fan_out = dims[i], dims[i + 1]
        key, kw, kb = jax.random.split(key, 3)
        bound = 1.0 / float(fan_in) ** 0.5
        w = jax.random.uniform(kw, (fan_in, fan_out), dtype, -bound, bound)
        b = jax.random.uniform(kb, (fan_out,), dtype, -bound, bound)
        params.append((w, b))
    return params


@functools.partial(jax.jit, static_argnames=("sequence_length", "row_tile",
                                              "chunk", "use_bf16"))
def fc_ndvi_forward(ndvi, years, seasons, params, *, sequence_length: int,
                    row_tile: int = 8192, chunk: int = 512,
                    use_bf16: bool = False):
    """Pallas implementation of FullyConnectedNDVIModel.forward."""
    del years, seasons  # unused by the PyTorch forward as well

    # --- glue: flatten exactly like ndvi.view(-1, seq_len) (no copy) ---
    x = ndvi.reshape(-1, sequence_length)
    n_rows = x.shape[0]

    LANE = 128
    rows_aligned = _round_up(max(n_rows, 1), LANE)
    # Cap the tile so the grid keeps >= 2 "parallel" steps when rows allow,
    # so both v7x TensorCores get work (harmless on 1-TC v5e/v6e).
    half = _round_up((rows_aligned + 1) // 2, LANE)
    row_tile_eff = max(LANE, min(_round_up(max(row_tile, 1), LANE), half))
    chunk_eff = _choose_chunk(row_tile_eff, chunk)
    n_chunks = row_tile_eff // chunk_eff
    grid_steps = (n_rows + row_tile_eff - 1) // row_tile_eff  # ragged last tile OK

    # --- convert PyTorch-layout params to kernel layout ---
    num_hidden = len(params) - 1           # Linear layers followed by ReLU
    num_rest = num_hidden - 1              # identical (H, H) hidden layers

    w0T = jnp.transpose(params[0][0]).astype(jnp.float32)        # (H, seq)
    b0 = params[0][1].reshape(-1, 1).astype(jnp.float32)         # (H, 1)
    kparams = [w0T, b0]
    if num_rest > 0:
        w_rest = jnp.stack([jnp.transpose(params[i][0])
                            for i in range(1, num_hidden)]).astype(jnp.float32)
        b_rest = jnp.stack([params[i][1].reshape(-1, 1)
                            for i in range(1, num_hidden)]).astype(jnp.float32)
        kparams += [w_rest, b_rest]                              # (R,H,H), (R,H,1)
    w_last = params[-1][0].reshape(-1, 1).astype(jnp.float32)    # (H, 1)
    b_last = params[-1][1].reshape(1, 1).astype(jnp.float32)     # (1, 1)
    kparams += [w_last, b_last]

    kernel = _make_mlp_kernel(num_rest, n_chunks, chunk_eff, use_bf16)

    # BlockSpecs: tile only the row axis of x / out; every weight and bias is a
    # full block with a constant block index (stays VMEM-resident).
    x_spec = pl.BlockSpec((row_tile_eff, sequence_length), lambda i: (i, 0))
    param_specs = [pl.BlockSpec(p.shape, (lambda i, _nd=p.ndim: (0,) * _nd))
                   for p in kparams]
    out_spec = pl.BlockSpec((1, row_tile_eff), lambda i: (0, i))

    out = pl.pallas_call(
        kernel,
        out_shape=jax.ShapeDtypeStruct((1, n_rows), jnp.float32),
        grid_spec=pltpu.PrefetchScalarGridSpec(
            num_scalar_prefetch=0,
            grid=(grid_steps,),
            in_specs=[x_spec] + param_specs,
            out_specs=out_spec,
        ),
        compiler_params=pltpu.CompilerParams(
            dimension_semantics=("parallel",),
        ),
    )(x, *kparams)

    # --- glue: squeeze(-1) ---
    return out[0]


def fc_ndvi_reference(ndvi, params, sequence_length):
    """Pure-JAX reference (PyTorch math layout) for correctness checking."""
    h = ndvi.reshape(-1, sequence_length).astype(jnp.float32)
    n = len(params)
    for i, (w, b) in enumerate(params):
        h = h @ w.astype(jnp.float32) + b.astype(jnp.float32)
        if i < n - 1:
            h = jnp.maximum(h, 0.0)
    return h[:, 0]


if __name__ == "__main__":
    sequence_length = 8
    hidden_size = 32
    num_layers = 2   # -> Linear(8,32), ReLU, Linear(32,32), ReLU, Linear(32,1)

    key = jax.random.PRNGKey(0)
    k_ndvi, k_years, k_seasons, k_params, k_big, k_p1 = jax.random.split(key, 6)

    params = init_params(k_params, sequence_length, hidden_size, num_layers)

    # Small case: ndvi (batch=2, pixels=8, seq=8) -> view(-1, 8) gives 16 rows.
    ndvi = jax.random.normal(k_ndvi, (2, 8, sequence_length), jnp.float32)
    years = jax.random.normal(k_years, (2, 8, sequence_length), jnp.float32)
    seasons = jax.random.normal(k_seasons, (2, 8, sequence_length), jnp.float32)

    # f32 tolerance allows for MXU bf16-pass rounding differences between the
    # Mosaic kernel and XLA's reference matmuls; real bugs give O(0.1+) errors.
    TOL = 2e-3

    out = fc_ndvi_forward(ndvi, years, seasons, params,
                          sequence_length=sequence_length)
    out = jax.block_until_ready(out)
    ref = fc_ndvi_reference(ndvi, params, sequence_length)
    assert out.shape == (16,), out.shape
    assert jnp.allclose(out, ref, atol=TOL, rtol=TOL), "mismatch vs reference"

    # Larger, ragged row count: multi-step "parallel" grid, masked boundary
    # tile (no wrapper-side transpose or padded copy of the input).
    ndvi_big = jax.random.normal(k_big, (2, 300, sequence_length), jnp.float32)
    out_big = fc_ndvi_forward(ndvi_big, ndvi_big, ndvi_big, params,
                              sequence_length=sequence_length, row_tile=256)
    out_big = jax.block_until_ready(out_big)
    ref_big = fc_ndvi_reference(ndvi_big, params, sequence_length)
    assert out_big.shape == (600,), out_big.shape
    assert jnp.allclose(out_big, ref_big, atol=TOL, rtol=TOL), "mismatch (big)"

    # bf16 MXU operands (single-pass matmuls, f32 accumulation): looser tolerance.
    out_bf16 = fc_ndvi_forward(ndvi_big, ndvi_big, ndvi_big, params,
                               sequence_length=sequence_length, use_bf16=True)
    out_bf16 = jax.block_until_ready(out_bf16)
    assert out_bf16.shape == (600,), out_bf16.shape
    assert jnp.allclose(out_bf16, ref_big, atol=5e-2, rtol=5e-2), "mismatch (bf16)"

    # num_layers=1 exercises the "no stacked (H,H) hidden layers" path.
    params1 = init_params(k_p1, sequence_length, hidden_size, 1)
    out1 = fc_ndvi_forward(ndvi, years, seasons, params1,
                           sequence_length=sequence_length)
    out1 = jax.block_until_ready(out1)
    ref1 = fc_ndvi_reference(ndvi, params1, sequence_length)
    assert jnp.allclose(out1, ref1, atol=TOL, rtol=TOL), "mismatch (1 layer)"

    print("KERNEL_OK")
</pallas_src>

<mosaic_0001>
module attributes {stable_mosaic.version = 11 : i64} {
  func.func @kernel(%arg0: i32, %arg1: memref<128x8xf32, #tpu.memory_space<vmem>>, %arg2: memref<32x8xf32, #tpu.memory_space<vmem>>, %arg3: memref<32x1xf32, #tpu.memory_space<vmem>>, %arg4: memref<1x32x32xf32, #tpu.memory_space<vmem>>, %arg5: memref<1x32x1xf32, #tpu.memory_space<vmem>>, %arg6: memref<32x1xf32, #tpu.memory_space<vmem>>, %arg7: memref<1x1xf32, #tpu.memory_space<vmem>>, %arg8: memref<1x128xf32, #tpu.memory_space<vmem>>) attributes {dimension_semantics = [#tpu.dimension_semantics<parallel>], iteration_bounds = array<i64: 1>, scalar_prefetch = 0 : i64, scratch_operands = 0 : i64, tpu.core_type = #tpu.core_type<tc>, window_params = [{transform_indices = @transform_0, window_bounds = array<i64: 128, 8>}, {pipeline_mode = #tpu.pipeline_mode<synchronous>, transform_indices = @transform_1, window_bounds = array<i64: 32, 8>}, {pipeline_mode = #tpu.pipeline_mode<synchronous>, transform_indices = @transform_2, window_bounds = array<i64: 32, 1>}, {pipeline_mode = #tpu.pipeline_mode<synchronous>, transform_indices = @transform_3, window_bounds = array<i64: 1, 32, 32>}, {pipeline_mode = #tpu.pipeline_mode<synchronous>, transform_indices = @transform_4, window_bounds = array<i64: 1, 32, 1>}, {pipeline_mode = #tpu.pipeline_mode<synchronous>, transform_indices = @transform_5, window_bounds = array<i64: 32, 1>}, {pipeline_mode = #tpu.pipeline_mode<synchronous>, transform_indices = @transform_6, window_bounds = array<i64: 1, 1>}, {transform_indices = @transform_7, window_bounds = array<i64: 1, 128>}]} {
    %c0 = arith.constant 0 : index
    %c0_0 = arith.constant 0 : index
    %0 = vector.load %arg2[%c0, %c0_0] : memref<32x8xf32, #tpu.memory_space<vmem>>, vector<32x8xf32>
    %c0_1 = arith.constant 0 : index
    %c0_2 = arith.constant 0 : index
    %1 = vector.load %arg3[%c0_1, %c0_2] : memref<32x1xf32, #tpu.memory_space<vmem>>, vector<32x1xf32>
    %c0_3 = arith.constant 0 : index
    %c0_4 = arith.constant 0 : index
    %c0_5 = arith.constant 0 : index
    %2 = vector.load %arg4[%c0_3, %c0_4, %c0_5] : memref<1x32x32xf32, #tpu.memory_space<vmem>>, vector<1x32x32xf32>
    %3 = vector.shape_cast %2 : vector<1x32x32xf32> to vector<32x32xf32>
    %c0_6 = arith.constant 0 : index
    %c0_7 = arith.constant 0 : index
    %c0_8 = arith.constant 0 : index
    %4 = vector.load %arg5[%c0_6, %c0_7, %c0_8] : memref<1x32x1xf32, #tpu.memory_space<vmem>>, vector<1x32x1xf32>
    %5 = vector.shape_cast %4 : vector<1x32x1xf32> to vector<32x1xf32>
    %c0_9 = arith.constant 0 : index
    %c0_10 = arith.constant 0 : index
    %6 = vector.load %arg6[%c0_9, %c0_10] : memref<32x1xf32, #tpu.memory_space<vmem>>, vector<32x1xf32>
    %c0_11 = arith.constant 0 : index
    %c0_12 = arith.constant 0 : index
    %7 = vector.load %arg7[%c0_11, %c0_12] : memref<1x1xf32, #tpu.memory_space<vmem>>, vector<1x1xf32>
    %c0_i32 = arith.constant 0 : i32
    %c128_i32 = arith.constant 128 : i32
    %8 = arith.muli %c0_i32, %c128_i32 : i32
    %9 = tpu.assume_multiple %8, 128 : i32
    %10 = arith.index_cast %9 : i32 to index
    %c0_13 = arith.constant 0 : index
    %11 = vector.load %arg1[%10, %c0_13] : memref<128x8xf32, #tpu.memory_space<vmem>>, vector<128x8xf32>
    %cst = arith.constant dense<0.000000e+00> : vector<32x128xf32>
    %12 = tpu.matmul %0, %11, %cst {dimension_numbers = #tpu.dot_dimension_numbers<[1], [1], [0], [0], [0, 0, 1, 0], [], []>} : vector<32x8xf32>, vector<128x8xf32>, vector<32x128xf32> -> vector<32x128xf32>
    %13 = vector.broadcast %1 : vector<32x1xf32> to vector<32x128xf32>
    %14 = arith.addf %12, %13 : vector<32x128xf32>
    %cst_14 = arith.constant 0.000000e+00 : f32
    %15 = vector.broadcast %cst_14 : f32 to vector<32x128xf32>
    %16 = arith.maximumf %14, %15 : vector<32x128xf32>
    %cst_15 = arith.constant dense<0.000000e+00> : vector<32x128xf32>
    %17 = tpu.matmul %3, %16, %cst_15 {dimension_numbers = #tpu.dot_dimension_numbers<[1], [0], [0], [1], [0, 0, 1, 1], [], []>} : vector<32x32xf32>, vector<32x128xf32>, vector<32x128xf32> -> vector<32x128xf32>
    %18 = vector.broadcast %5 : vector<32x1xf32> to vector<32x128xf32>
    %19 = arith.addf %17, %18 : vector<32x128xf32>
    %cst_16 = arith.constant 0.000000e+00 : f32
    %20 = vector.broadcast %cst_16 : f32 to vector<32x128xf32>
    %21 = arith.maximumf %19, %20 : vector<32x128xf32>
    %22 = vector.broadcast %6 : vector<32x1xf32> to vector<32x128xf32>
    %23 = arith.mulf %21, %22 : vector<32x128xf32>
    %cst_17 = arith.constant dense<0.000000e+00> : vector<128xf32>
    %24 = vector.multi_reduction <add>, %23, %cst_17 [0] : vector<32x128xf32> to vector<128xf32>
    %25 = vector.shape_cast %24 : vector<128xf32> to vector<1x128xf32>
    %26 = vector.broadcast %7 : vector<1x1xf32> to vector<1x128xf32>
    %27 = arith.addf %25, %26 : vector<1x128xf32>
    %c0_18 = arith.constant 0 : index
    %28 = arith.index_cast %9 : i32 to index
    %29 = vector.load %arg8[%c0_18, %28] : memref<1x128xf32, #tpu.memory_space<vmem>>, vector<1x128xf32>
    tpu.vector_store %arg8[%c0_18, %28], %27 {strides = array<i32>} : memref<1x128xf32, #tpu.memory_space<vmem>>, vector<1x128xf32>,
    %c1_i32 = arith.constant 1 : i32
    return
  }
  func.func @transform_0(%arg0: i32) -> (i32, i32) {
    %c0_i32 = arith.constant 0 : i32
    %c0_i32_0 = arith.constant 0 : i32
    return %arg0, %c0_i32 : i32, i32
  }
  func.func @transform_1(%arg0: i32) -> (i32, i32) {
    %c0_i32 = arith.constant 0 : i32
    %c0_i32_0 = arith.constant 0 : i32
    %c0_i32_1 = arith.constant 0 : i32
    return %c0_i32, %c0_i32_0 : i32, i32
  }
  func.func @transform_2(%arg0: i32) -> (i32, i32) {
    %c0_i32 = arith.constant 0 : i32
    %c0_i32_0 = arith.constant 0 : i32
    %c0_i32_1 = arith.constant 0 : i32
    return %c0_i32, %c0_i32_0 : i32, i32
  }
  func.func @transform_3(%arg0: i32) -> (i32, i32, i32) {
    %c0_i32 = arith.constant 0 : i32
    %c0_i32_0 = arith.constant 0 : i32
    %c0_i32_1 = arith.constant 0 : i32
    %c0_i32_2 = arith.constant 0 : i32
    return %c0_i32, %c0_i32_0, %c0_i32_1 : i32, i32, i32
  }
  func.func @transform_4(%arg0: i32) -> (i32, i32, i32) {
    %c0_i32 = arith.constant 0 : i32
    %c0_i32_0 = arith.constant 0 : i32
    %c0_i32_1 = arith.constant 0 : i32
    %c0_i32_2 = arith.constant 0 : i32
    return %c0_i32, %c0_i32_0, %c0_i32_1 : i32, i32, i32
  }
  func.func @transform_5(%arg0: i32) -> (i32, i32) {
    %c0_i32 = arith.constant 0 : i32
    %c0_i32_0 = arith.constant 0 : i32
    %c0_i32_1 = arith.constant 0 : i32
    return %c0_i32, %c0_i32_0 : i32, i32
  }
  func.func @transform_6(%arg0: i32) -> (i32, i32) {
    %c0_i32 = arith.constant 0 : i32
    %c0_i32_0 = arith.constant 0 : i32
    %c0_i32_1 = arith.constant 0 : i32
    return %c0_i32, %c0_i32_0 : i32, i32
  }
  func.func @transform_7(%arg0: i32) -> (i32, i32) {
    %c0_i32 = arith.constant 0 : i32
    %c0_i32_0 = arith.constant 0 : i32
    return %c0_i32, %arg0 : i32, i32
  }
}

</mosaic_0001>

<bundles_post_ra>
// kernel: fc_ndvi_forward.1
= control target key start
LH: loop header
LB: loop body
LE: loop exit
PB: predicated region body
PF: predicated region fallthrough
CT: control target
= control target key end

     0   :  { %s815_s0 = inlined_call_operand.vmem [shape: f32[16,8], index: 0, kind: input, shape index: {}]   ;;  %s816_s1 = inlined_call_operand.vmem [shape: f32[32,8], index: 1, kind: input, shape index: {}]   ;;  %s817_s2 = inlined_call_operand.vmem [shape: f32[32,1], index: 2, kind: input, shape index: {}]   ;;  %s818_s3 = inlined_call_operand.vmem [shape: f32[1,32,32], index: 3, kind: input, shape index: {}]   ;;  %s819_s4 = inlined_call_operand.vmem [shape: f32[1,32,1], index: 4, kind: input, shape index: {}]   ;;  %s820_s5 = inlined_call_operand.vmem [shape: f32[32,1], index: 5, kind: input, shape index: {}]   ;;  %s821_s6 = inlined_call_operand.<no memory space> [shape: f32[1,1], index: 6, kind: input, shape index: {}]   ;;  %s822_s7 = inlined_call_operand.hbm [shape: f32[1,16], index: 7, kind: output, shape index: {}]  }
   0x1   :  { %v12_v0 = vstv %s821_s6 }
   0x2   :  { %13 = vst [vmem:[#allocation2] sm:$0x1] %v12_v0 }
   0x3   :  { %v50_v1 = vld [vmem:[%s815_s0] sm:$0xff]  ;;  %v51_v2 = vld [vmem:[%s815_s0 + $0x8] sm:$0xff]  ;;  %vm86_vm0 = vcmask 64512   ;;  %v52_v3 = vld [vmem:[%s815_s0 + $0x10] sm:$0xff]  ;;  %v604_v7 = vmov 0  }
   0x4   :  { %v520_v4 = vpack.c.bf16 %v51_v2, %v50_v1  ;;  %vm660_vm1 = vmpackc.low %vm86_vm0, %vm86_vm0  ;;  %v53_v6 = vld [vmem:[%s815_s0 + $0x18] sm:$0xff]  ;;  %578 = vset.pattern.permute.xlu0 %v604_v7  ;;  %579 = vset.pattern.permute.xlu1 %v604_v7  ;;  %v29_v9 = vld [vmem:[%s816_s1] sm:$0xff] }
   0x5   :  { %v526_v8 = vpack.c.bf16 %v53_v6, %v52_v3  ;;  %v54_v10 = vld [vmem:[%s815_s0 + $0x20] sm:$0xff]  ;;  %v55_v11 = vld [vmem:[%s815_s0 + $0x28] sm:$0xff]  ;;  %500 = vmatprep.mubr.msk.f32.mxu0 %vm86_vm0, %v29_v9  ;;  %v35_v13 = vld [vmem:[%s817_s2 + $0x10] sm:$0xff] }
   0x6   :  { %522 = vmatprep.subr.msk.bf16.mxu0 %vm660_vm1, %v520_v4  ;;  %v33_v12 = vld [vmem:[%s817_s2] sm:$0xff]  ;;  %78 = vperm.xlu1 %579, %v35_v13   ;;  %v532_v14 = vpack.c.bf16 %v55_v11, %v54_v10  ;;  %v34_v15 = vld [vmem:[%s817_s2 + $0x8] sm:$0xff]  ;;  %v36_v16 = vld [vmem:[%s817_s2 + $0x18] sm:$0xff] }
   0x7   :  { %525 = vmatpush3.bf16.xpose.msk.msra.mxu0 %vm660_vm1, %v520_v4  ;;  %68 = vperm.xlu0 %578, %v33_v12  }
   0x8   :  { %528 = vmatprep.subr.msk.bf16.mxu0 %vm660_vm1, %v526_v8 }
   0x9   :  { %14 = vsyncpa [#allocation4], 0  ;;  %v41_v17 = vld [vmem:[%s819_s4] sm:$0xff]  ;;  %v56_v18 = vld [vmem:[%s815_s0 + $0x30] sm:$0xff]  ;;  %vm256_vm2 = vcmask 261120  }
   0xa   :  { %83 = vperm.xlu1 %579, %v36_v16   ;;  %v57_v19 = vld [vmem:[%s815_s0 + $0x38] sm:$0xff]  ;;  %v42_v20 = vld [vmem:[%s819_s4 + $0x8] sm:$0xff]  ;;  %v43_v22 = vld [vmem:[%s819_s4 + $0x10] sm:$0xff] }
   0xb   :  { %73 = vperm.xlu0 %578, %v34_v15   ;;  %v538_v21 = vpack.c.bf16 %v57_v19, %v56_v18  ;;  %v44_v23 = vld [vmem:[%s819_s4 + $0x18] sm:$0xff]  ;;  %v45_v24 = vld [vmem:[%s820_s5] sm:$0xff]  ;;  %v59_v26 = vld [vmem:[%s815_s0 + $0x48] sm:$0xff] }
   0xc   :  { %v58_v25 = vld [vmem:[%s815_s0 + $0x40] sm:$0xff]  ;;  %v46_v27 = vld [vmem:[%s820_s5 + $0x8] sm:$0xff]  ;;  %v47_v29 = vld [vmem:[%s820_s5 + $0x10] sm:$0xff] }
   0xd   :  { %v544_v28 = vpack.c.bf16 %v59_v26, %v58_v25  ;;  %v48_v30 = vld [vmem:[%s820_s5 + $0x18] sm:$0xff]  ;;  %v49_v31 = vld [vmem:[#allocation2] sm:$0x1]  ;;  %v60_v32 = vld [vmem:[%s815_s0 + $0x50] sm:$0xff] }
   0xe   :  { %243 = vperm.xlu1 %579, %v42_v20   ;;  %v61_v33 = vld [vmem:[%s815_s0 + $0x58] sm:$0xff]  ;;  %v62_v35 = vld [vmem:[%s815_s0 + $0x60] sm:$0xff]  ;;  %v63_v36 = vld [vmem:[%s815_s0 + $0x68] sm:$0xff] }
   0xf   :  { %531 = vmatpush3.bf16.xpose.msk.msra.mxu0 %vm660_vm1, %v526_v8  ;;  %238 = vperm.xlu0 %578, %v41_v17   ;;  %v550_v34 = vpack.c.bf16 %v61_v33, %v60_v32  ;;  %v556_v37 = vpack.c.bf16 %v63_v36, %v62_v35  ;;  %v64_v38 = vld [vmem:[%s815_s0 + $0x70] sm:$0xff]  ;;  %v65_v39 = vld [vmem:[%s815_s0 + $0x78] sm:$0xff]  ;;  %v30_v41 = vld [vmem:[%s816_s1 + $0x8] sm:$0xff] }
  0x10   :  { %534 = vmatprep.subr.msk.bf16.mxu0 %vm660_vm1, %v532_v14  ;;  %v562_v40 = vpack.c.bf16 %v65_v39, %v64_v38  ;;  %v31_v42 = vld [vmem:[%s816_s1 + $0x10] sm:$0xff]  ;;  %v32_v43 = vld [vmem:[%s816_s1 + $0x18] sm:$0xff]  ;;  %v37_v44 = vld [vmem:[%s818_s3] sm:$0xff] }
  0x11   :  { %514 = vmatprep.mubr.msk.f32.mxu1 %vm256_vm2, %v37_v44  ;;  %v38_v63 = vld [vmem:[%s818_s3 + $0x8] sm:$0xff]  ;;  %v39_v0 = vld [vmem:[%s818_s3 + $0x10] sm:$0xff]  ;;  %v40_v1 = vld [vmem:[%s818_s3 + $0x18] sm:$0xff]  ;;  %s605_s3 = smov [#allocation3]  }
  0x12   :  { %253 = vperm.xlu1 %579, %v44_v23   ;;  %s408_s19 = sshll.u32 %s605_s3, 4  ;;  %s409_s19 = int_to_ptr.vmem [resolvable:$true] %s408_s19 }
  0x13   :  { %248 = vperm.xlu0 %578, %v43_v22   ;;  %s580_s20 = scalar_lea.vmem %s409_s19, 16  ;;  %s584_s21 = scalar_lea.vmem %s409_s19, 32 }
  0x14   :  { %p581_p0 = scmp.ne.s32.totalorder %s409_s19, %s580_s20  ;;  %p585_p1 = scmp.lt.s32.totalorder %s409_s19, %s409_s19 }
  0x15   :  { %p586_p2 = scmp.lt.s32.totalorder %s584_s21, %s580_s20 }
  0x16   :  { %365 = vperm.xlu1 %579, %v46_v27  }
  0x17   :  { %537 = vmatpush3.bf16.xpose.msk.msra.mxu0 %vm660_vm1, %v532_v14  ;;  %360 = vperm.xlu0 %578, %v45_v24   ;;  %p587_p3 = por %p586_p2, %p585_p1 }
  0x18   :  { %540 = vmatprep.subr.msk.bf16.mxu0 %vm660_vm1, %v538_v21 }
  0x19   :  { %p588_p4 = pnand %p587_p3, %p581_p0 }
  0x1a   :  { %375 = vperm.xlu1 %579, %v48_v30  }
  0x1b   :  { %370 = vperm.xlu0 %578, %v47_v29  }
  0x1f   :  { %543 = vmatpush3.bf16.xpose.msk.msra.mxu0 %vm660_vm1, %v538_v21  ;;  %393 = vperm.xlu0 %578, %v49_v31  }
  0x20   :  { %546 = vmatprep.subr.msk.bf16.mxu0 %vm660_vm1, %v544_v28 }
  0x27   :  { %549 = vmatpush3.bf16.xpose.msk.msra.mxu0 %vm660_vm1, %v544_v28  ;;  %v396_v28 = vlaneseq }
  0x28   :  { %552 = vmatprep.subr.msk.bf16.mxu0 %vm660_vm1, %v550_v34 }
  0x29   :  { %v397_v31 = vshrl.u32 %v396_v28, 7 }
  0x2f   :  { %555 = vmatpush3.bf16.xpose.msk.msra.mxu0 %vm660_vm1, %v550_v34  ;;  %v398_v34 = vsub.s32 0, %v397_v31 }
  0x30   :  { %558 = vmatprep.subr.msk.bf16.mxu0 %vm660_vm1, %v556_v37 }
  0x37   :  { %561 = vmatpush3.bf16.xpose.msk.msra.mxu0 %vm660_vm1, %v556_v37 }
  0x38   :  { %564 = vmatprep.subr.msk.bf16.mxu0 %vm660_vm1, %v562_v40 }
  0x3f   :  { %567 = vmatpush3.bf16.xpose.msk.msra.mxu0 %vm660_vm1, %v562_v40 }
  0x46   :  { %501 = vmatmul.mubr.msk.f32.vlgmr.msra.gmra.mrb[0].mxu0 %vm86_vm0, %v30_v41 }
  0x47   :  { %503 = vmatprep.mubr.msk.f32.mxu0 %vm86_vm0, %v31_v42 }
  0x4a   :  { %504 = vmatmul.mubr.msk.f32.gmra.mrb[2].mxu0 %vm86_vm0, %v32_v43 }
  0x85   :  { %v79_v46 = vpop.permute.xlu1 %78 }
  0x86   :  { %v69_v45 = vpop.permute.xlu0 %68 }
  0x89   :  { %v84_v53 = vpop.permute.xlu1 %83 }
  0x8a   :  { %v74_v47 = vpop.permute.xlu0 %73 }
  0x8d   :  { %v244_v3 = vpop.permute.xlu1 %243 }
  0x8e   :  { %v239_v2 = vpop.permute.xlu0 %238 }
  0x91   :  { %v254_v5 = vpop.permute.xlu1 %253 }
  0x92   :  { %v249_v4 = vpop.permute.xlu0 %248 }
  0x95   :  { %v366_v12 = vpop.permute.xlu1 %365 }
  0x96   :  { %v361_v10 = vpop.permute.xlu0 %360 }
  0x99   :  { %v376_v25 = vpop.permute.xlu1 %375 }
  0x9a   :  { %v371_v23 = vpop.permute.xlu0 %370 }
  0x9e   :  { %v394_v36 = vpop.permute.xlu0 %393 }
  0x9f   :  { %v399_v38 = vrot.slane %v394_v36, %v398_v34 }
 0x119   :  { %v502_v48 = vpop.f32.mrb[0].mxu0 }
 0x11a   :  { %v219_v49 = vadd.f32 %v502_v48, %v74_v47  ;;  %v213_v50 = vpop.f32.mrb[1].mxu0 }
 0x11b   :  { %v214_v51 = vadd.f32 %v213_v50, %v69_v45 }
 0x11c   :  { %v233_v52 = vmax.f32 %v219_v49, 0.0 }
 0x11d   :  { %v232_v54 = vmax.f32 %v214_v51, 0.0  ;;  %v505_v55 = vpop.f32.mrb[2].mxu0 }
 0x11e   :  { %v229_v56 = vadd.f32 %v505_v55, %v84_v53  ;;  %v223_v57 = vpop.f32.mrb[3].mxu0 }
 0x11f   :  { %v224_v58 = vadd.f32 %v223_v57, %v79_v46  ;;  %v568_v59 = vpack.c.bf16 %v233_v52, %v232_v54 }
 0x120   :  { %v235_v60 = vmax.f32 %v229_v56, 0.0 }
 0x121   :  { %v234_v61 = vmax.f32 %v224_v58, 0.0  ;;  %569 = vmatprep.subr.bf16.mxu1 %v568_v59 }
 0x122   :  { %571 = vmatpush3.bf16.msra.mxu1 %v568_v59 }
 0x123   :  { %v572_v62 = vpack.c.bf16 %v235_v60, %v234_v61 }
 0x125   :  { %573 = vmatprep.subr.bf16.mxu1 %v572_v62 }
 0x126   :  { %575 = vmatpush3.bf16.msra.mxu1 %v572_v62 }
 0x129   :  { %515 = vmatmul.mubr.msk.f32.vlgmr.msra.gmra.mrb[0].mxu1 %vm256_vm2, %v38_v63 }
 0x12a   :  { %517 = vmatprep.mubr.msk.f32.mxu1 %vm256_vm2, %v39_v0 }
 0x12d   :  { %518 = vmatmul.mubr.msk.f32.gmra.mrb[2].mxu1 %vm256_vm2, %v40_v1 }
 0x1fc   :  { %v516_v6 = vpop.f32.mrb[0].mxu1 }
 0x1fd   :  { %v341_v7 = vadd.f32 %v516_v6, %v244_v3  ;;  %v335_v8 = vpop.f32.mrb[1].mxu1 }
 0x1fe   :  { %v336_v9 = vadd.f32 %v335_v8, %v239_v2 }
 0x1ff   :  { %v355_v11 = vmax.f32 %v341_v7, 0.0 }
 0x200   :  { %v354_v13 = vmax.f32 %v336_v9, 0.0  ;;  %v519_v14 = vpop.f32.mrb[2].mxu1 }
 0x201   :  { %v379_v15 = vmul.f32 %v366_v12, %v355_v11  ;;  %v351_v16 = vadd.f32 %v519_v14, %v254_v5  ;;  %v345_v17 = vpop.f32.mrb[3].mxu1 }
 0x202   :  { %v378_v18 = vmul.f32 %v361_v10, %v354_v13  ;;  %v346_v19 = vadd.f32 %v345_v17, %v249_v4 }
 0x203   :  { %v357_v21 = vmax.f32 %v351_v16, 0.0 }
 0x204   :  { %v382_v20 = vadd.f32 %v379_v15, %v378_v18  ;;  %v356_v22 = vmax.f32 %v346_v19, 0.0 }
 0x205   :  { %v381_v26 = vmul.f32 %v376_v25, %v357_v21 }
 0x206   :  { %v380_v24 = vmul.f32 %v371_v23, %v356_v22 }
 0x208   :  { %v383_v27 = vadd.f32 %v382_v20, %v380_v24 }
 0x20a   :  { %v384_v29 = vadd.f32 %v383_v27, %v381_v26 }
 0x20c   :  { %v385_v30 = vrot.slane %v384_v29, 4 }
 0x20e   :  { %v386_v32 = vadd.f32 %v385_v30, %v384_v29 }
 0x210   :  { %v387_v33 = vrot.slane %v386_v32, 2 }
 0x212   :  { %v388_v35 = vadd.f32 %v387_v33, %v386_v32 }
 0x214   :  { %v389_v37 = vrot.slane %v388_v35, 1 }
 0x216   :  { %v390_v39 = vadd.f32 %v389_v37, %v388_v35 }
 0x218   :  { %v400_v40 = vadd.f32 %v399_v38, %v390_v39 }
 0x21a   :  { %401 = vst [vmem:[#allocation3] sm:$0x1] %v400_v40 }
 0x21b   :  { %591 = shalt.err (!%p588_p4)
}
 0x21c   :  { %s592_s24 = scalar_lea.hbm %s822_s7, 16 }
 0x21d   :  { %p593_p5 = scmp.ne.s32.totalorder %s822_s7, %s592_s24  ;;  %p596_p6 = scmp.lt.u32.totalorder %s592_s24, %s822_s7 }
 0x21f   :  { %p598_p7 = pnand %p596_p6, %p593_p5 }
 0x221   :  { %601 = shalt.err (!%p598_p7)
}
 0x222   :  { %411 = dma.vmem_to_hbm [thread:$0]  %s409_s19, 16, %s822_s7, [#allocation4]  }
 0x223   :  { %602 = dma.done.wait [#allocation4], 16  }
 0x224   :  { %603 = vsyncadd [#allocation4], 4294967280 }
 0x225   :  { %415 = vsyncpa [#allocation4], 1 }

</bundles_post_ra>
